<compile_context>
chip_gen: v5e
topology: v5e:2x2
jax: 0.10.0
libtpu: 0.0.40
codegen_flags: <defaults>
</compile_context>

<pallas_src>
import jax
import jax.numpy as jnp
from jax.experimental import pallas as pl
from jax.experimental.pallas import tpu as pltpu


def _round_up(x, m):
    return ((x + m - 1) // m) * m


def _make_kernel_whole_b(p, batch):
    """Whole batch kept in one block: out = mean_B(likelihood) for one T tile."""
    one_m_p = float(1.0 - p)
    c1 = float(1.0 / ((1.0 - p) * batch))   # multiplies targets (1/B folded in)
    c2 = float(1.0 / ((2.0 - p) * batch))   # multiplies preds   (1/B folded in)

    def kernel(pred_ref, tgt_ref, out_ref):
        preds = jnp.maximum(pred_ref[...].astype(jnp.float32), 1e-10)
        tgts = tgt_ref[...].astype(jnp.float32)
        # a = preds**(1-p);  preds**(2-p) = preds * a   (one log + one exp)
        a = jnp.exp(one_m_p * jnp.log(preds))
        lik = a * (preds * c2 - tgts * c1)
        # batch mean = sublane (XLU) sum; 1/B already folded into c1/c2
        out_ref[...] = jnp.sum(lik, axis=0, keepdims=True)

    return kernel


def _make_kernel_tiled_b(p, batch, tile_b):
    """Large-B fallback: B is a trailing reduction grid axis; the output block
    stays resident across it and acts as the accumulator."""
    one_m_p = float(1.0 - p)
    c1 = float(1.0 / ((1.0 - p) * batch))
    c2 = float(1.0 / ((2.0 - p) * batch))

    def kernel(pred_ref, tgt_ref, out_ref):
        bi = pl.program_id(1)

        @pl.when(bi == 0)
        def _():
            out_ref[...] = jnp.zeros_like(out_ref)

        preds = jnp.maximum(pred_ref[...].astype(jnp.float32), 1e-10)
        tgts = tgt_ref[...].astype(jnp.float32)
        a = jnp.exp(one_m_p * jnp.log(preds))
        lik = a * (preds * c2 - tgts * c1)
        # mask sublanes past the true batch size (ragged last B block)
        row = jax.lax.broadcasted_iota(jnp.int32, lik.shape, 0) + bi * tile_b
        lik = jnp.where(row < batch, lik, 0.0)
        out_ref[...] += jnp.sum(lik, axis=0, keepdims=True)

    return kernel


def tweedie_loss(predictions, targets, p=1.1, reduction="mean",
                 tile_t=None, vmem_budget_bytes=24 * 1024 * 1024):
    """Pallas implementation of TweedieLoss.forward (reduction='mean').

    predictions/targets: leading dims (B, T) (trailing singletons flattened,
    matching PyTorch's `.view(B, T)`). Returns float32 loss of shape (T, 1).
    `p` must be a Python float in (1, 2) (constants are folded at trace time).
    """
    p = float(p)
    assert 1.0 < p < 2.0, "Variance power should be in 1..2 interval"
    assert reduction == "mean", "only the default 'mean' reduction is implemented"

    B, T = int(targets.shape[0]), int(targets.shape[1])
    preds2d = predictions.reshape(B, T)      # native dtype; cast happens in VMEM
    tgts2d = targets.reshape(B, T)

    itemsize = max(jnp.dtype(preds2d.dtype).itemsize,
                   jnp.dtype(tgts2d.dtype).itemsize)

    def footprint(tb, tt):                   # double-buffered input bytes
        return 2 * 2 * tb * tt * itemsize

    # largest legal lane tile: a multiple of 128, or the whole of a short T
    max_tile_t = T if T < 128 else (T // 128) * 128

    cost = pl.CostEstimate(flops=6 * B * T,
                           transcendentals=2 * B * T,
                           bytes_accessed=2 * B * T * itemsize + 4 * T)

    use_b_tiling = footprint(B, min(128, max_tile_t)) > vmem_budget_bytes

    if not use_b_tiling:
        # ---- fast path: whole B per block, 1-D grid over T ----
        if tile_t is None:
            if T < 128:
                tile_t = T
            else:
                cap = max(128, (vmem_budget_bytes // (4 * B * itemsize) // 128) * 128)
                # keep 2..8 grid steps (v7x megacore) while tiles stay >= 512 lanes
                steps = max(1, min(8, T // 512))
                want = _round_up(pl.cdiv(T, steps), 128)
                tile_t = min(cap, want, max_tile_t)
        else:
            tile_t = T if T < 128 else max(128, min((tile_t // 128) * 128, max_tile_t))

        num_t = pl.cdiv(T, tile_t)
        vmem_limit = min(64 << 20, max(32 << 20, footprint(B, tile_t) + (4 << 20)))

        out = pl.pallas_call(
            _make_kernel_whole_b(p, B),
            out_shape=jax.ShapeDtypeStruct((1, T), jnp.float32),
            grid=(num_t,),
            in_specs=[pl.BlockSpec((B, tile_t), lambda i: (0, i)),
                      pl.BlockSpec((B, tile_t), lambda i: (0, i))],
            out_specs=pl.BlockSpec((1, tile_t), lambda i: (0, i)),
            compiler_params=pltpu.CompilerParams(
                dimension_semantics=("parallel",),
                vmem_limit_bytes=vmem_limit),
            cost_estimate=cost,
        )(preds2d, tgts2d)
    else:
        # ---- large-B fallback: B tiled as a trailing "arbitrary" reduction axis ----
        if tile_t is None:
            tile_t = T if T < 128 else min(512, max_tile_t)
        else:
            tile_t = T if T < 128 else max(128, min((tile_t // 128) * 128, max_tile_t))
        tile_b = (vmem_budget_bytes // (4 * tile_t * itemsize) // 8) * 8
        tile_b = max(8, min(tile_b, _round_up(B, 8)))
        num_t = pl.cdiv(T, tile_t)
        num_b = pl.cdiv(B, tile_b)
        vmem_limit = min(64 << 20, max(32 << 20, footprint(tile_b, tile_t) + (4 << 20)))

        out = pl.pallas_call(
            _make_kernel_tiled_b(p, B, tile_b),
            out_shape=jax.ShapeDtypeStruct((1, T), jnp.float32),
            grid=(num_t, num_b),
            in_specs=[pl.BlockSpec((tile_b, tile_t), lambda i, j: (j, i)),
                      pl.BlockSpec((tile_b, tile_t), lambda i, j: (j, i))],
            out_specs=pl.BlockSpec((1, tile_t), lambda i, j: (0, i)),
            compiler_params=pltpu.CompilerParams(
                dimension_semantics=("parallel", "arbitrary"),
                vmem_limit_bytes=vmem_limit),
            cost_estimate=cost,
        )(preds2d, tgts2d)

    # unsqueeze(-1) then mean over dim 0  ==  (T, 1)
    return out.reshape(T, 1)


def _tweedie_ref(predictions, targets, p=1.1):
    """Pure-JAX reference mirroring the PyTorch formula exactly."""
    preds = predictions.astype(jnp.float32)
    preds = jnp.where(preds < 1e-10, 1e-10, preds)
    tgts = targets.astype(jnp.float32)
    log_preds = jnp.log(preds)
    lik = (-tgts * jnp.exp(log_preds * (1 - p)) / (1 - p)
           + jnp.exp(log_preds * (2 - p)) / (2 - p))
    lik = lik.reshape(targets.shape[0], targets.shape[1])
    return jnp.mean(lik[..., None], axis=0)


if __name__ == "__main__":
    key = jax.random.PRNGKey(0)
    kp, kt = jax.random.split(key)

    # 1) fast path, f32, T a multiple of 128, auto tile size
    B, T = 8, 384
    preds = jax.nn.softplus(jax.random.normal(kp, (B, T), dtype=jnp.float32))
    tgts = jnp.abs(jax.random.normal(kt, (B, T), dtype=jnp.float32))
    loss = jax.block_until_ready(tweedie_loss(preds, tgts, p=1.1))
    ref = _tweedie_ref(preds, tgts, p=1.1)
    assert loss.shape == (T, 1), loss.shape
    assert jnp.allclose(loss, ref, rtol=1e-5, atol=1e-5), "mismatch (fast path)"

    # 2) fast path, ragged T (partial edge block), explicit tile -> multi-step grid
    B2, T2 = 20, 200
    preds2 = jax.nn.softplus(jax.random.normal(kp, (B2, T2), dtype=jnp.float32))
    tgts2 = jnp.abs(jax.random.normal(kt, (B2, T2), dtype=jnp.float32))
    loss2 = jax.block_until_ready(tweedie_loss(preds2, tgts2, p=1.3, tile_t=128))
    ref2 = _tweedie_ref(preds2, tgts2, p=1.3)
    assert loss2.shape == (T2, 1), loss2.shape
    assert jnp.allclose(loss2, ref2, rtol=1e-5, atol=1e-5), "mismatch (ragged T)"

    # 3) bf16 inputs streamed natively, cast to f32 inside the kernel
    preds3 = preds.astype(jnp.bfloat16)
    tgts3 = tgts.astype(jnp.bfloat16)
    loss3 = jax.block_until_ready(tweedie_loss(preds3, tgts3, p=1.1))
    ref3 = _tweedie_ref(preds3, tgts3, p=1.1)
    assert jnp.allclose(loss3, ref3, rtol=1e-5, atol=1e-5), "mismatch (bf16)"

    # 4) large-B fallback (forced via a tiny VMEM budget): B reduction axis with
    #    output-resident accumulator + ragged B and T edge masking
    loss4 = jax.block_until_ready(
        tweedie_loss(preds2, tgts2, p=1.3, vmem_budget_bytes=1))
    assert jnp.allclose(loss4, ref2, rtol=1e-5, atol=1e-5), "mismatch (tiled-B)"

    print("KERNEL_OK")
</pallas_src>

<mosaic_0001>
module attributes {stable_mosaic.version = 11 : i64} {
  func.func @kernel(%arg0: i32, %arg1: memref<8x384xf32, #tpu.memory_space<vmem>>, %arg2: memref<8x384xf32, #tpu.memory_space<vmem>>, %arg3: memref<1x384xf32, #tpu.memory_space<vmem>>) attributes {dimension_semantics = [#tpu.dimension_semantics<parallel>], iteration_bounds = array<i64: 1>, scalar_prefetch = 0 : i64, scratch_operands = 0 : i64, tpu.core_type = #tpu.core_type<tc>, window_params = [{transform_indices = @transform_0, window_bounds = array<i64: 8, 384>}, {transform_indices = @transform_1, window_bounds = array<i64: 8, 384>}, {transform_indices = @transform_2, window_bounds = array<i64: 1, 384>}]} {
    %c0 = arith.constant 0 : index
    %c0_0 = arith.constant 0 : index
    %0 = vector.load %arg1[%c0, %c0_0] : memref<8x384xf32, #tpu.memory_space<vmem>>, vector<8x384xf32>
    %cst = arith.constant 1.000000e-10 : f32
    %1 = vector.broadcast %cst : f32 to vector<8x384xf32>
    %2 = arith.maximumf %0, %1 : vector<8x384xf32>
    %c0_1 = arith.constant 0 : index
    %c0_2 = arith.constant 0 : index
    %3 = vector.load %arg2[%c0_1, %c0_2] : memref<8x384xf32, #tpu.memory_space<vmem>>, vector<8x384xf32>
    %4 = math.log %2 : vector<8x384xf32>
    %cst_3 = arith.constant -1.000000e-01 : f32
    %5 = vector.broadcast %cst_3 : f32 to vector<8x384xf32>
    %6 = arith.mulf %5, %4 : vector<8x384xf32>
    %7 = math.exp %6 : vector<8x384xf32>
    %cst_4 = arith.constant 0.138888896 : f32
    %8 = vector.broadcast %cst_4 : f32 to vector<8x384xf32>
    %9 = arith.mulf %2, %8 : vector<8x384xf32>
    %cst_5 = arith.constant -1.250000e+00 : f32
    %10 = vector.broadcast %cst_5 : f32 to vector<8x384xf32>
    %11 = arith.mulf %3, %10 : vector<8x384xf32>
    %12 = arith.subf %9, %11 : vector<8x384xf32>
    %13 = arith.mulf %7, %12 : vector<8x384xf32>
    %cst_6 = arith.constant dense<0.000000e+00> : vector<384xf32>
    %14 = vector.multi_reduction <add>, %13, %cst_6 [0] : vector<8x384xf32> to vector<384xf32>
    %15 = vector.shape_cast %14 : vector<384xf32> to vector<1x384xf32>
    %c0_7 = arith.constant 0 : index
    %c0_8 = arith.constant 0 : index
    %16 = vector.load %arg3[%c0_7, %c0_8] : memref<1x384xf32, #tpu.memory_space<vmem>>, vector<1x384xf32>
    tpu.vector_store %arg3[%c0_7, %c0_8], %15 {strides = array<i32>} : memref<1x384xf32, #tpu.memory_space<vmem>>, vector<1x384xf32>,
    return
  }
  func.func @transform_0(%arg0: i32) -> (i32, i32) {
    %c0_i32 = arith.constant 0 : i32
    %c0_i32_0 = arith.constant 0 : i32
    return %c0_i32, %arg0 : i32, i32
  }
  func.func @transform_1(%arg0: i32) -> (i32, i32) {
    %c0_i32 = arith.constant 0 : i32
    %c0_i32_0 = arith.constant 0 : i32
    return %c0_i32, %arg0 : i32, i32
  }
  func.func @transform_2(%arg0: i32) -> (i32, i32) {
    %c0_i32 = arith.constant 0 : i32
    %c0_i32_0 = arith.constant 0 : i32
    return %c0_i32, %arg0 : i32, i32
  }
}

</mosaic_0001>

<bundles_post_ra>
// kernel: tpu_custom_call.1
= control target key start
LH: loop header
LB: loop body
LE: loop exit
PB: predicated region body
PF: predicated region fallthrough
CT: control target
= control target key end

     0   :  { %7 = vsyncpa [#allocation3], 0  ;;  %s247_s0 = inlined_call_operand.hbm [shape: f32[8,384], index: 0, kind: input, shape index: {}]   ;;  %s248_s1 = inlined_call_operand.hbm [shape: f32[8,384], index: 1, kind: input, shape index: {}]   ;;  %s249_s2 = inlined_call_operand.hbm [shape: f32[1,384], index: 2, kind: output, shape index: {}]  }
   0x1   :  { %8 = vsyncpa [#allocation6], 0 }
   0x2   :  { %9 = vsyncpa [#allocation4], 0  ;;  %s15_s11 = sshll.u32 %s247_s0, 4  ;;  %s220_s12 = smov [#allocation2]   ;;  %s16_s11 = int_to_ptr.hbm [resolvable:$true] %s15_s11 }
   0x3   :  { %s17_s13 = sshll.u32 %s220_s12, 4  ;;  %s26_s16 = sshll.u32 %s248_s1, 4  ;;  %s18_s13 = int_to_ptr.vmem [resolvable:$true] %s17_s13  ;;  %s27_s16 = int_to_ptr.hbm [resolvable:$true] %s26_s16 }
   0x4   :  { %20 = dma.hbm_to_vmem [thread:$0]  %s16_s11, 384, %s18_s13, [#allocation3]  }
   0x5   :  { %s221_s17 = smov [#allocation5]  }
   0x6   :  { %s28_s18 = sshll.u32 %s221_s17, 4  ;;  %s29_s18 = int_to_ptr.vmem [resolvable:$true] %s28_s18 }
   0x7   :  { %31 = dma.hbm_to_vmem [thread:$0]  %s27_s16, 384, %s29_s18, [#allocation6]  }
   0x8   :  { %214 = dma.done.wait [#allocation3], 384  }
   0x9   :  { %215 = vsyncadd [#allocation3], 4294966912 }
   0xa   :  { %216 = dma.done.wait [#allocation6], 384  }
   0xb   :  { %217 = vsyncadd [#allocation6], 4294966912  ;;  %v40_v0 = vld [vmem:[#allocation2] sm:$0xff]  ;;  %v41_v1 = vld [vmem:[#allocation2 + $0x8] sm:$0xff]  ;;  %v104_v51 = vlaneseq  ;;  %vm99_vm0 = vcmask 1040384   ;;  %s222_s0 = smov [#allocation7]  }
   0xc   :  { %v42_v2 = vld [vmem:[#allocation2 + $0x10] sm:$0xff]  ;;  %v43_v3 = vmax.f32 %v40_v0, 1e-10  ;;  %v44_v4 = vmax.f32 %v41_v1, 1e-10  ;;  %v46_v11 = vld [vmem:[#allocation5] sm:$0xff] }
   0xd   :  { %v45_v5 = vmax.f32 %v42_v2, 1e-10  ;;  %v47_v14 = vld [vmem:[#allocation5 + $0x8] sm:$0xff]  ;;  %v48_v16 = vld [vmem:[#allocation5 + $0x10] sm:$0xff]  ;;  %v67_v21 = vmul.f32 -1.25, %v46_v11  ;;  %s114_s1 = sshll.u32 %s222_s0, 4  ;;  %s115_s1 = int_to_ptr.vmem [resolvable:$true] %s114_s1 }
   0xe   :  { %130 = vlog2.f32 %v43_v3  ;;  %v64_v20 = vmul.f32 0.1388889, %v43_v3  ;;  %v65_v23 = vmul.f32 0.1388889, %v44_v4  ;;  %v68_v24 = vmul.f32 -1.25, %v47_v14  ;;  %s116_s21 = sshll.u32 %s249_s2, 4  ;;  %s117_s21 = int_to_ptr.hbm [resolvable:$true] %s116_s21 }
   0xf   :  { %132 = vlog2.f32 %v44_v4  ;;  %v66_v25 = vmul.f32 0.1388889, %v45_v5  ;;  %v69_v26 = vmul.f32 -1.25, %v48_v16  ;;  %vm101_vm1 = vcmask 1041408  }
  0x10   :  { %134 = vlog2.f32 %v45_v5  ;;  %v70_v27 = vsub.f32 %v64_v20, %v67_v21  ;;  %v71_v28 = vsub.f32 %v65_v23, %v68_v24  ;;  %vm106_vm2 = vcmp.lt.s32.totalorder %v104_v51, 384 }
  0x11   :  { %v72_v29 = vsub.f32 %v66_v25, %v69_v26 }
  0x14   :  { %v131_v6 = vpop.eup %130 }
  0x15   :  { %v133_v7 = vpop.eup %132  ;;  %v50_v8 = vmul.f32 0.6931472, %v131_v6 }
  0x16   :  { %v135_v9 = vpop.eup %134  ;;  %v52_v10 = vmul.f32 0.6931472, %v133_v7 }
  0x17   :  { %v54_v12 = vmul.f32 0.6931472, %v135_v9  ;;  %v55_v13 = vmul.f32 -0.1, %v50_v8 }
  0x18   :  { %v56_v15 = vmul.f32 -0.1, %v52_v10 }
  0x19   :  { %v57_v17 = vmul.f32 -0.1, %v54_v12  ;;  %v58_v18 = vmul.f32 1.442695, %v55_v13 }
  0x1a   :  { %v60_v19 = vmul.f32 1.442695, %v56_v15 }
  0x1b   :  { %136 = vpow2.f32 %v58_v18  ;;  %v62_v22 = vmul.f32 1.442695, %v57_v17 }
  0x1c   :  { %138 = vpow2.f32 %v60_v19 }
  0x1d   :  { %140 = vpow2.f32 %v62_v22 }
  0x21   :  { %v137_v30 = vpop.eup %136 }
  0x22   :  { %v139_v31 = vpop.eup %138  ;;  %v73_v32 = vmul.f32 %v137_v30, %v70_v27 }
  0x23   :  { %v141_v33 = vpop.eup %140  ;;  %v74_v34 = vmul.f32 %v139_v31, %v71_v28 }
  0x24   :  { %v75_v35 = vmul.f32 %v141_v33, %v72_v29  ;;  %v76_v36 = vrot.slane %v73_v32, 4 }
  0x25   :  { %v82_v37 = vrot.slane %v74_v34, 4 }
  0x26   :  { %v77_v38 = vadd.f32 %v76_v36, %v73_v32  ;;  %v88_v39 = vrot.slane %v75_v35, 4 }
  0x27   :  { %v83_v40 = vadd.f32 %v82_v37, %v74_v34 }
  0x28   :  { %v78_v41 = vrot.slane %v77_v38, 2  ;;  %v89_v42 = vadd.f32 %v88_v39, %v75_v35 }
  0x29   :  { %v84_v43 = vrot.slane %v83_v40, 2 }
  0x2a   :  { %v79_v44 = vadd.f32 %v78_v41, %v77_v38  ;;  %v90_v45 = vrot.slane %v89_v42, 2 }
  0x2b   :  { %v85_v46 = vadd.f32 %v84_v43, %v83_v40 }
  0x2c   :  { %v80_v47 = vrot.slane %v79_v44, 1  ;;  %v91_v48 = vadd.f32 %v90_v45, %v89_v42 }
  0x2d   :  { %v86_v49 = vrot.slane %v85_v46, 1 }
  0x2e   :  { %v92_v50 = vrot.slane %v91_v48, 1  ;;  %v81_v52 = vadd.f32 %v80_v47, %v79_v44 }
  0x2f   :  { %v87_v53 = vadd.f32 %v86_v49, %v85_v46 }
  0x30   :  { %v93_v54 = vadd.f32 %v92_v50, %v91_v48 }
  0x31   :  { %v97_v55 = vrot.slane %v87_v53, 7 }
  0x32   :  { %v98_v56 = vrot.slane %v93_v54, 6 }
  0x33   :  { %v100_v57 = vsel %vm99_vm0, %v81_v52, %v97_v55 }
  0x34   :  { %v102_v58 = vsel %vm101_vm1, %v100_v57, %v98_v56 }
  0x35   :  { %108 = vst.msk [vmem:[#allocation7] sm:$0x7] %vm106_vm2, %v102_v58 }
  0x36   :  { %119 = dma.vmem_to_hbm [thread:$0]  %s115_s1, 48, %s117_s21, [#allocation4]  }
  0x37   :  { %218 = dma.done.wait [#allocation4], 48  }
  0x38   :  { %219 = vsyncadd [#allocation4], 4294967248 }
  0x39   :  { %124 = vsyncpa [#allocation3], 1 }
  0x3a   :  { %125 = vsyncpa [#allocation6], 1 }
  0x3b   :  { %126 = vsyncpa [#allocation4], 1 }

</bundles_post_ra>
